<compile_context>
chip_gen: v7x
topology: tpu7x:2x2x1
jax: 0.10.0
libtpu: 0.0.40
codegen_flags: <defaults>
</compile_context>

<pallas_src>
import jax
import jax.numpy as jnp
from jax.experimental import pallas as pl
from jax.experimental.pallas import tpu as pltpu  # noqa: F401  (TPU backend)

_LANES = 128     # lane-dense output width
_SUBLANES = 8    # f32 sublane granularity


def _fused_qk_kernel(x_ref, p_ref, out_ref):
    # x_ref  : (M_pad, 3) f32 (zero rows beyond the real M)
    # p_ref  : (8, 128) f32 packed parameters:
    #   p[0:3, 0:8]  = W1            p[0:3, 8:24] = W1 @ W2
    #   p[3,   0:8]  = b1            p[3,   8:24] = b1 @ W2 + b2
    #   everything else zero (padding lanes / sublanes)
    # out_ref: (M_pad, 128) lane-dense slab; cols 0..23 hold [q | k].
    x = x_ref[...]
    p = p_ref[...]
    # K=3 contraction as explicit VPU broadcast-FMAs (no MXU pass).
    out = (x[:, 0:1] * p[0:1, :]
           + x[:, 1:2] * p[1:2, :]
           + x[:, 2:3] * p[2:3, :]
           + p[3:4, :])
    out_ref[...] = out.astype(out_ref.dtype)


def fused_qk(x_flat_padded, packed_params):
    """x_flat_padded: (M_pad, 3) f32, packed_params: (8, 128) f32 -> (M_pad, 128)."""
    m_pad = x_flat_padded.shape[0]
    cost = pl.CostEstimate(
        flops=7 * m_pad * _LANES,
        transcendentals=0,
        bytes_accessed=4 * (x_flat_padded.size + packed_params.size
                            + m_pad * _LANES),
    )
    return pl.pallas_call(
        _fused_qk_kernel,
        out_shape=jax.ShapeDtypeStruct((m_pad, _LANES), jnp.float32),
        grid=(1,),
        in_specs=[
            pl.BlockSpec((m_pad, 3), lambda i: (0, 0)),
            pl.BlockSpec((_SUBLANES, _LANES), lambda i: (0, 0)),
        ],
        out_specs=pl.BlockSpec((m_pad, _LANES), lambda i: (0, 0)),
        cost_estimate=cost,
    )(x_flat_padded, packed_params)


def pack_params(w1, b1, w2, b2):
    """Fold linear2 into linear1 and pack into one zero-padded (8, 128) buffer.

    Call ONCE at init time (hoisted out of the per-call forward path).
    """
    wk = w1 @ w2              # (3, 16)
    bk = b1 @ w2 + b2         # (16,)
    p = jnp.zeros((_SUBLANES, _LANES), jnp.float32)
    p = p.at[0:3, 0:8].set(w1)
    p = p.at[0:3, 8:24].set(wk)
    p = p.at[3, 0:8].set(b1)
    p = p.at[3, 8:24].set(bk)
    return p


def model_forward(x, packed_params):
    """x: (B, S, 3) float32, packed_params: (8, 128) f32 from pack_params.

    Returns (q, k, v, attn_mask) matching the PyTorch module's tensors.
    """
    B, S, _ = x.shape
    m = B * S
    m_pad = ((m + _SUBLANES - 1) // _SUBLANES) * _SUBLANES
    x_flat = x.reshape(m, 3)
    if m_pad != m:  # pad rows to a sublane multiple -> unmasked full stores
        x_flat = jnp.pad(x_flat, ((0, m_pad - m), (0, 0)))
    slab = fused_qk(x_flat, packed_params)          # (m_pad, 128) lane-dense
    q = slab[:m, 0:8].reshape(B, S, 8)
    # TODO(synk): original forward calls linear2(x) with 3 input features while
    #             linear2 expects 8 (always errors in PyTorch); we compute the
    #             nearest shape-consistent interpretation k = linear2(linear1(x)).
    k = slab[:m, 8:24].reshape(B, S, 16)
    # TODO(synk): torch.empty(...) yields uninitialized memory with no Pallas
    #             equivalent; v / attn_mask are returned as zeros and kept
    #             OUTSIDE the kernel (constant-foldable by XLA, no extra DMAs).
    v = jnp.zeros((5, 4, 16), jnp.float32)
    attn_mask = jnp.zeros((5, 4, 4), jnp.bool_)
    return q, k, v, attn_mask


def init_params(key):
    """Deterministic init mimicking nn.Linear (uniform +-1/sqrt(fan_in)).

    Weights stored pre-transposed as (in_features, out_features); biases 1-D.
    """
    k1, k2, k3, k4 = jax.random.split(key, 4)
    bound1 = 1.0 / jnp.sqrt(3.0)
    bound2 = 1.0 / jnp.sqrt(8.0)
    w1 = jax.random.uniform(k1, (3, 8), jnp.float32, -bound1, bound1)
    b1 = jax.random.uniform(k2, (8,), jnp.float32, -bound1, bound1)
    w2 = jax.random.uniform(k3, (8, 16), jnp.float32, -bound2, bound2)
    b2 = jax.random.uniform(k4, (16,), jnp.float32, -bound2, bound2)
    return w1, b1, w2, b2


if __name__ == "__main__":
    key = jax.random.PRNGKey(0)
    pkey, xkey = jax.random.split(key)
    params = init_params(pkey)

    # Parameter fold + pack happens exactly once, outside the forward path.
    packed = jax.block_until_ready(pack_params(*params))

    # Shapes implied by the module's forward: batch=5, seq=4, in_features=3.
    x = jax.random.normal(xkey, (5, 4, 3), jnp.float32)

    fwd = jax.jit(model_forward)
    q, k, v, attn_mask = fwd(x, packed)
    jax.block_until_ready((q, k, v, attn_mask))

    # Sanity check against plain-JAX reference (unfolded sequential form).
    w1, b1, w2, b2 = params
    q_ref = x @ w1 + b1
    k_ref = q_ref @ w2 + b2
    assert q.shape == (5, 4, 8) and k.shape == (5, 4, 16)
    assert v.shape == (5, 4, 16) and attn_mask.shape == (5, 4, 4)
    assert jnp.allclose(q, q_ref, atol=1e-5)
    assert jnp.allclose(k, k_ref, atol=1e-5)

    print("KERNEL_OK")
</pallas_src>

<mosaic_0001>
module attributes {stable_mosaic.version = 11 : i64} {
  func.func @_fused_qk_kernel(%arg0: i32, %arg1: memref<24x3xf32, #tpu.memory_space<vmem>>, %arg2: memref<8x128xf32, #tpu.memory_space<vmem>>, %arg3: memref<24x128xf32, #tpu.memory_space<vmem>>) attributes {dimension_semantics = [#tpu.dimension_semantics<arbitrary>], iteration_bounds = array<i64: 1>, scalar_prefetch = 0 : i64, scratch_operands = 0 : i64, tpu.core_type = #tpu.core_type<tc>, window_params = [{pipeline_mode = #tpu.pipeline_mode<synchronous>, transform_indices = @transform_0, window_bounds = array<i64: 24, 3>}, {pipeline_mode = #tpu.pipeline_mode<synchronous>, transform_indices = @transform_1, window_bounds = array<i64: 8, 128>}, {pipeline_mode = #tpu.pipeline_mode<synchronous>, transform_indices = @transform_2, window_bounds = array<i64: 24, 128>}]} {
    %c0 = arith.constant 0 : index
    %c0_0 = arith.constant 0 : index
    %0 = vector.load %arg1[%c0, %c0_0] : memref<24x3xf32, #tpu.memory_space<vmem>>, vector<24x3xf32>
    %c0_1 = arith.constant 0 : index
    %c0_2 = arith.constant 0 : index
    %1 = vector.load %arg2[%c0_1, %c0_2] : memref<8x128xf32, #tpu.memory_space<vmem>>, vector<8x128xf32>
    %2 = vector.extract_strided_slice %0 {offsets = [0, 0], sizes = [24, 1], strides = [1, 1]} : vector<24x3xf32> to vector<24x1xf32>
    %3 = vector.extract_strided_slice %1 {offsets = [0, 0], sizes = [1, 128], strides = [1, 1]} : vector<8x128xf32> to vector<1x128xf32>
    %4 = vector.broadcast %2 : vector<24x1xf32> to vector<24x128xf32>
    %5 = vector.broadcast %3 : vector<1x128xf32> to vector<24x128xf32>
    %6 = arith.mulf %4, %5 : vector<24x128xf32>
    %7 = vector.extract_strided_slice %0 {offsets = [0, 1], sizes = [24, 1], strides = [1, 1]} : vector<24x3xf32> to vector<24x1xf32>
    %8 = vector.extract_strided_slice %1 {offsets = [1, 0], sizes = [1, 128], strides = [1, 1]} : vector<8x128xf32> to vector<1x128xf32>
    %9 = vector.broadcast %7 : vector<24x1xf32> to vector<24x128xf32>
    %10 = vector.broadcast %8 : vector<1x128xf32> to vector<24x128xf32>
    %11 = arith.mulf %9, %10 : vector<24x128xf32>
    %12 = arith.addf %6, %11 : vector<24x128xf32>
    %13 = vector.extract_strided_slice %0 {offsets = [0, 2], sizes = [24, 1], strides = [1, 1]} : vector<24x3xf32> to vector<24x1xf32>
    %14 = vector.extract_strided_slice %1 {offsets = [2, 0], sizes = [1, 128], strides = [1, 1]} : vector<8x128xf32> to vector<1x128xf32>
    %15 = vector.broadcast %13 : vector<24x1xf32> to vector<24x128xf32>
    %16 = vector.broadcast %14 : vector<1x128xf32> to vector<24x128xf32>
    %17 = arith.mulf %15, %16 : vector<24x128xf32>
    %18 = arith.addf %12, %17 : vector<24x128xf32>
    %19 = vector.extract_strided_slice %1 {offsets = [3, 0], sizes = [1, 128], strides = [1, 1]} : vector<8x128xf32> to vector<1x128xf32>
    %20 = vector.broadcast %19 : vector<1x128xf32> to vector<24x128xf32>
    %21 = arith.addf %18, %20 : vector<24x128xf32>
    %c0_3 = arith.constant 0 : index
    %c0_4 = arith.constant 0 : index
    %22 = vector.load %arg3[%c0_3, %c0_4] : memref<24x128xf32, #tpu.memory_space<vmem>>, vector<24x128xf32>
    tpu.vector_store %arg3[%c0_3, %c0_4], %21 {strides = array<i32>} : memref<24x128xf32, #tpu.memory_space<vmem>>, vector<24x128xf32>,
    return
  }
  func.func @transform_0(%arg0: i32) -> (i32, i32) {
    %c0_i32 = arith.constant 0 : i32
    %c0_i32_0 = arith.constant 0 : i32
    %c0_i32_1 = arith.constant 0 : i32
    return %c0_i32, %c0_i32_0 : i32, i32
  }
  func.func @transform_1(%arg0: i32) -> (i32, i32) {
    %c0_i32 = arith.constant 0 : i32
    %c0_i32_0 = arith.constant 0 : i32
    %c0_i32_1 = arith.constant 0 : i32
    return %c0_i32, %c0_i32_0 : i32, i32
  }
  func.func @transform_2(%arg0: i32) -> (i32, i32) {
    %c0_i32 = arith.constant 0 : i32
    %c0_i32_0 = arith.constant 0 : i32
    %c0_i32_1 = arith.constant 0 : i32
    return %c0_i32, %c0_i32_0 : i32, i32
  }
}

</mosaic_0001>

<bundles_post_ra>
// kernel: model_forward.1
= control target key start
LH: loop header
LB: loop body
LE: loop exit
PB: predicated region body
PF: predicated region fallthrough
CT: control target
= control target key end

     0   :  { %v104_v0 = vmov 0   ;;  %v105_v4 = vmov 1   ;;  %v106_v5 = vmov 2   ;;  %v30_v6 = vlaneseq  ;;  %s143_s0 = inlined_call_operand.vmem [shape: f32[24,3], index: 0, kind: input, shape index: {}]   ;;  %s144_s1 = inlined_call_operand.vmem [shape: f32[8,128], index: 1, kind: input, shape index: {}]   ;;  %s145_s2 = inlined_call_operand.vmem [shape: f32[24,128], index: 2, kind: output, shape index: {}]  }
   0x1   :  { %99 = vset.pattern.permute.xlu1 %v104_v0  ;;  %98 = vset.pattern.permute.xlu0 %v104_v0  ;;  %v13_v1 = vld [vmem:[%s143_s0 + $0x10] sm:$0xff]  ;;  %v11_v2 = vld [vmem:[%s143_s0] sm:$0xff]  ;;  %v12_v3 = vld [vmem:[%s143_s0 + $0x8] sm:$0xff] }
   0x2   :  { %27 = vperm.xlu1 %99, %v13_v1   ;;  %17 = vperm.xlu0 %98, %v11_v2   ;;  %v31_v7 = vshrl.u32 %v30_v6, 7  ;;  %v14_v13 = vld [vmem:[%s144_s1] sm:$0xff] }
   0x4   :  { %v51_v10 = vsub.s32 1, %v31_v7  ;;  %v32_v11 = vsub.s32 0, %v31_v7  ;;  %v73_v16 = vsub.s32 2, %v31_v7  ;;  %v83_v22 = vsub.s32 3, %v31_v7 }
   0x6   :  { %100 = vset.pattern.permute.xlu1 %v105_v4  ;;  %22 = vperm.xlu0 %98, %v12_v3   ;;  %v52_v15 = vrot.slane %v14_v13, %v51_v10  ;;  %v33_v17 = vrot.slane %v14_v13, %v32_v11  ;;  %v74_v24 = vrot.slane %v14_v13, %v73_v16 }
   0x7   :  { %38 = vperm.xlu1 %100, %v11_v2   ;;  %v84_v27 = vrot.slane %v14_v13, %v83_v22 }
   0xa   :  { %101 = vset.pattern.permute.xlu0 %v105_v4 }
   0xb   :  { %46 = vperm.xlu1 %100, %v13_v1   ;;  %42 = vperm.xlu0 %101, %v12_v3  }
   0xf   :  { %102 = vset.pattern.permute.xlu1 %v106_v5  ;;  %103 = vset.pattern.permute.xlu0 %v106_v5 }
  0x10   :  { %60 = vperm.xlu1 %102, %v11_v2   ;;  %64 = vperm.xlu0 %103, %v12_v3  }
  0x14   :  { %68 = vperm.xlu1 %102, %v13_v1  }
  0x81   :  { %v28_v8 = vpop.permute.xlu1 %27  ;;  %v18_v9 = vpop.permute.xlu0 %17 }
  0x82   :  { %v34_v20 = vmul.f32 %v33_v17, %v18_v9  ;;  %v36_v34 = vmul.f32 %v33_v17, %v28_v8 }
  0x85   :  { %v23_v12 = vpop.permute.xlu0 %22 }
  0x86   :  { %v39_v14 = vpop.permute.xlu1 %38  ;;  %v35_v25 = vmul.f32 %v33_v17, %v23_v12 }
  0x87   :  { %v53_v21 = vmul.f32 %v52_v15, %v39_v14 }
  0x89   :  { %v56_v26 = vadd.f32 %v53_v21, %v34_v20 }
  0x8a   :  { %v47_v18 = vpop.permute.xlu1 %46  ;;  %v43_v19 = vpop.permute.xlu0 %42 }
  0x8b   :  { %v54_v23 = vmul.f32 %v52_v15, %v43_v19  ;;  %v55_v30 = vmul.f32 %v52_v15, %v47_v18 }
  0x8d   :  { %v57_v31 = vadd.f32 %v54_v23, %v35_v25  ;;  %v58_v38 = vadd.f32 %v55_v30, %v36_v34 }
  0x8f   :  { %v61_v28 = vpop.permute.xlu1 %60  ;;  %v65_v29 = vpop.permute.xlu0 %64 }
  0x90   :  { %v75_v32 = vmul.f32 %v74_v24, %v61_v28  ;;  %v76_v33 = vmul.f32 %v74_v24, %v65_v29 }
  0x92   :  { %v78_v35 = vadd.f32 %v75_v32, %v56_v26  ;;  %v79_v36 = vadd.f32 %v76_v33, %v57_v31 }
  0x93   :  { %v69_v37 = vpop.permute.xlu1 %68 }
  0x94   :  { %v85_v39 = vadd.f32 %v84_v27, %v78_v35  ;;  %v86_v40 = vadd.f32 %v84_v27, %v79_v36  ;;  %v77_v41 = vmul.f32 %v74_v24, %v69_v37 }
  0x96   :  { %88 = vst [vmem:[%s145_s2] sm:$0xff] %v85_v39  ;;  %89 = vst [vmem:[%s145_s2 + $0x8] sm:$0xff] %v86_v40  ;;  %v80_v42 = vadd.f32 %v77_v41, %v58_v38 }
  0x98   :  { %v87_v43 = vadd.f32 %v84_v27, %v80_v42 }
  0x9a   :  { %90 = vst [vmem:[%s145_s2 + $0x10] sm:$0xff] %v87_v43 }

</bundles_post_ra>
